<compile_context>
chip_gen: v5e
topology: v5e:2x2
jax: 0.10.0
libtpu: 0.0.40
codegen_flags: <defaults>
</compile_context>

<pallas_src>
import jax
import jax.numpy as jnp
from jax.experimental import pallas as pl
from jax.experimental.pallas import tpu as pltpu

LANE = 128
SUBLANE = 8
# ~4 MiB per operand per buffer; with double-buffered input + output this is
# <= ~16 MiB (f32) -> inside v6e/v7x 32 MiB scoped defaults, and covered on
# v5e by the explicit vmem_limit_bytes below (128 MiB physical VMEM).
_TARGET_BLOCK_BYTES = 4 * 1024 * 1024
_VMEM_LIMIT_BYTES = 32 * 1024 * 1024
_WIDTH_CANDIDATES = (4096, 2048, 1024, 512, 256, 128)


def _sinusoidal_kernel(params_ref, x_ref, o_ref):
    # params_ref (SMEM): [frequency, phase, amplitude] as f32 scalars.
    freq = params_ref[0]
    phase = params_ref[1]
    amp = params_ref[2]
    x = x_ref[...].astype(jnp.float32)
    o_ref[...] = (amp * jnp.sin(freq * x + phase)).astype(o_ref.dtype)


def _pick_width(n_main):
    """Widest lane-dense width dividing n_main, preferring >= 8 rows."""
    for cand in _WIDTH_CANDIDATES:
        if n_main % cand == 0 and n_main // cand >= SUBLANE:
            return cand
    for cand in _WIDTH_CANDIDATES:  # tiny arrays: accept < 8 rows
        if n_main % cand == 0:
            return cand
    return LANE  # unreachable: n_main is a positive multiple of 128


def _run_pallas_2d(x2d, params, out_dtype):
    rows, width = x2d.shape
    in_itemsize = jnp.dtype(x2d.dtype).itemsize
    out_itemsize = jnp.dtype(out_dtype).itemsize
    itemsize = max(in_itemsize, out_itemsize)

    # Byte-targeted tile: ~_TARGET_BLOCK_BYTES per operand, multiple of 8 rows.
    block_elems = max(_TARGET_BLOCK_BYTES // itemsize, SUBLANE * width)
    tile_rows = max(SUBLANE, (block_elems // width) // SUBLANE * SUBLANE)

    # Guarantee multiple grid steps (v7x: 2 TCs + DMA/compute overlap) whenever
    # the row count allows it; harmless on v5e/v6e (single TC).
    if rows >= 4 * SUBLANE:
        min_steps = 4
    elif rows >= 2 * SUBLANE:
        min_steps = 2
    else:
        min_steps = 1
    if min_steps > 1:
        cap = max(SUBLANE, (-(-rows // min_steps)) // SUBLANE * SUBLANE)
        tile_rows = min(tile_rows, cap)
    tile_rows = min(tile_rows, rows)  # tiny arrays: single full-extent block

    grid = (pl.cdiv(rows, tile_rows),)  # ragged last block handled by Pallas

    n_elems = rows * width
    cost = pl.CostEstimate(
        flops=5 * n_elems,
        transcendentals=n_elems,
        bytes_accessed=n_elems * (in_itemsize + out_itemsize),
    )

    return pl.pallas_call(
        _sinusoidal_kernel,
        out_shape=jax.ShapeDtypeStruct((rows, width), out_dtype),
        grid_spec=pltpu.PrefetchScalarGridSpec(
            num_scalar_prefetch=0,
            grid=grid,
            in_specs=[
                pl.BlockSpec(memory_space=pltpu.MemorySpace.SMEM),
                pl.BlockSpec((tile_rows, width), lambda i: (i, 0)),
            ],
            out_specs=pl.BlockSpec((tile_rows, width), lambda i: (i, 0)),
        ),
        compiler_params=pltpu.CompilerParams(
            dimension_semantics=("parallel",),
            vmem_limit_bytes=_VMEM_LIMIT_BYTES,
        ),
        cost_estimate=cost,
    )(params, x2d)


def sinusoidal_forward(x, frequency, phase, amplitude):
    """y = amplitude * sin(frequency * x + phase), elementwise, via Pallas."""
    orig_shape = x.shape
    # PyTorch promotion: f32 parameters promote the result dtype to >= f32.
    out_dtype = jnp.promote_types(x.dtype, jnp.float32)

    params = jnp.stack(
        [jnp.reshape(frequency, ()), jnp.reshape(phase, ()), jnp.reshape(amplitude, ())]
    ).astype(jnp.float32)

    flat = x.reshape(-1)
    n = flat.shape[0]
    n_main = (n // LANE) * LANE

    if n_main == 0:
        # <128 elements: not worth a kernel launch, plain XLA.
        out = (params[2] * jnp.sin(params[0] * flat.astype(jnp.float32) + params[1]))
        return out.astype(out_dtype).reshape(orig_shape)

    width = _pick_width(n_main)

    if n_main == n:
        # Aligned size: zero extra copies around the kernel.
        out2d = _run_pallas_2d(flat.reshape(-1, width), params, out_dtype)
        return out2d.reshape(orig_shape)

    # Awkward size: kernel on the 128-aligned prefix + tiny XLA tail + 1 concat
    # (no full-tensor pad / slice round trip).
    head = flat[:n_main].reshape(-1, width)
    out_head = _run_pallas_2d(head, params, out_dtype).reshape(-1)
    tail = flat[n_main:]
    out_tail = (params[2] * jnp.sin(params[0] * tail.astype(jnp.float32) + params[1]))
    out_tail = out_tail.astype(out_dtype)
    return jnp.concatenate([out_head, out_tail]).reshape(orig_shape)


def reference_forward(x, frequency, phase, amplitude):
    return (amplitude * jnp.sin(frequency * x.astype(jnp.float32) + phase))


if __name__ == "__main__":
    key = jax.random.PRNGKey(0)
    kx, kf, kp, ka = jax.random.split(key, 4)

    # NCHW input, same convention as the PyTorch module would receive.
    x = jax.random.normal(kx, (2, 4, 16, 16), dtype=jnp.float32)

    # Deterministic "randn" scalar parameters (shape (1,) like nn.Parameter).
    frequency = jax.random.normal(kf, (1,), dtype=jnp.float32)
    phase = jax.random.normal(kp, (1,), dtype=jnp.float32)
    amplitude = jax.random.normal(ka, (1,), dtype=jnp.float32)

    y = sinusoidal_forward(x, frequency, phase, amplitude)
    y = jax.block_until_ready(y)
    y_ref = reference_forward(x, frequency[0], phase[0], amplitude[0])
    assert y.shape == x.shape and y.dtype == jnp.float32
    assert jnp.allclose(y, y_ref, atol=1e-5, rtol=1e-5)

    # Awkward (non-128-divisible) size: exercises prefix-kernel + XLA tail path.
    x2 = jax.random.normal(kx, (5, 13, 17), dtype=jnp.float32)  # 1105 elements
    y2 = jax.block_until_ready(sinusoidal_forward(x2, frequency, phase, amplitude))
    y2_ref = reference_forward(x2, frequency[0], phase[0], amplitude[0])
    assert y2.shape == x2.shape
    assert jnp.allclose(y2, y2_ref, atol=1e-5, rtol=1e-5)

    # Tiny (<128 elements): pure XLA fallback path.
    x3 = jax.random.normal(kx, (3, 5, 7), dtype=jnp.float32)
    y3 = jax.block_until_ready(sinusoidal_forward(x3, frequency, phase, amplitude))
    y3_ref = reference_forward(x3, frequency[0], phase[0], amplitude[0])
    assert jnp.allclose(y3, y3_ref, atol=1e-5, rtol=1e-5)

    print("KERNEL_OK")
</pallas_src>

<mosaic_0001>
module attributes {stable_mosaic.version = 11 : i64} {
  func.func @_sinusoidal_kernel(%arg0: i32, %arg1: memref<3xf32, #tpu.memory_space<smem>>, %arg2: memref<8x256xf32, #tpu.memory_space<vmem>>, %arg3: memref<8x256xf32, #tpu.memory_space<vmem>>) attributes {dimension_semantics = [#tpu.dimension_semantics<parallel>], iteration_bounds = array<i64: 1>, scalar_prefetch = 0 : i64, scratch_operands = 0 : i64, tpu.core_type = #tpu.core_type<tc>, window_params = [{transform_indices = @transform_0, window_bounds = array<i64: 3>}, {transform_indices = @transform_1, window_bounds = array<i64: 8, 256>}, {transform_indices = @transform_2, window_bounds = array<i64: 8, 256>}]} {
    %c0 = arith.constant 0 : index
    %0 = memref.load %arg1[%c0] : memref<3xf32, #tpu.memory_space<smem>>
    %c1 = arith.constant 1 : index
    %1 = memref.load %arg1[%c1] : memref<3xf32, #tpu.memory_space<smem>>
    %c2 = arith.constant 2 : index
    %2 = memref.load %arg1[%c2] : memref<3xf32, #tpu.memory_space<smem>>
    %c0_0 = arith.constant 0 : index
    %c0_1 = arith.constant 0 : index
    %3 = vector.load %arg2[%c0_0, %c0_1] : memref<8x256xf32, #tpu.memory_space<vmem>>, vector<8x256xf32>
    %4 = vector.broadcast %0 : f32 to vector<8x256xf32>
    %5 = arith.mulf %4, %3 : vector<8x256xf32>
    %6 = vector.broadcast %1 : f32 to vector<8x256xf32>
    %7 = arith.addf %5, %6 : vector<8x256xf32>
    %8 = math.sin %7 : vector<8x256xf32>
    %9 = vector.broadcast %2 : f32 to vector<8x256xf32>
    %10 = arith.mulf %9, %8 : vector<8x256xf32>
    %c0_2 = arith.constant 0 : index
    %c0_3 = arith.constant 0 : index
    %11 = vector.load %arg3[%c0_2, %c0_3] : memref<8x256xf32, #tpu.memory_space<vmem>>, vector<8x256xf32>
    tpu.vector_store %arg3[%c0_2, %c0_3], %10 {strides = array<i32>} : memref<8x256xf32, #tpu.memory_space<vmem>>, vector<8x256xf32>,
    return
  }
  func.func @transform_0(%arg0: i32) -> i32 {
    %c0_i32 = arith.constant 0 : i32
    %c0_i32_0 = arith.constant 0 : i32
    return %c0_i32 : i32
  }
  func.func @transform_1(%arg0: i32) -> (i32, i32) {
    %c0_i32 = arith.constant 0 : i32
    %c0_i32_0 = arith.constant 0 : i32
    return %arg0, %c0_i32 : i32, i32
  }
  func.func @transform_2(%arg0: i32) -> (i32, i32) {
    %c0_i32 = arith.constant 0 : i32
    %c0_i32_0 = arith.constant 0 : i32
    return %arg0, %c0_i32 : i32, i32
  }
}

</mosaic_0001>

<bundles_post_ra>
// kernel: tpu_custom_call.1
= control target key start
LH: loop header
LB: loop body
LE: loop exit
PB: predicated region body
PF: predicated region fallthrough
CT: control target
= control target key end

     0   :  { %7 = vsyncpa [#allocation5], 0  ;;  %s677_s0 = inlined_call_operand.hbm [shape: f32[3], index: 0, kind: input, shape index: {}]   ;;  %s678_s1 = inlined_call_operand.hbm [shape: f32[8,256], index: 1, kind: input, shape index: {}]   ;;  %s679_s2 = inlined_call_operand.hbm [shape: f32[8,256], index: 2, kind: output, shape index: {}]  }
   0x1   :  { %8 = vsyncpa [#allocation3], 0 }
   0x2   :  { %9 = vsyncpa [#allocation4], 0  ;;  %s15_s11 = sshll.u32 %s677_s0, 4  ;;  %s24_s14 = sshll.u32 %s678_s1, 4  ;;  %s16_s11 = int_to_ptr.hbm [resolvable:$true] %s15_s11  ;;  %s25_s14 = int_to_ptr.hbm [resolvable:$true] %s24_s14 }
   0x3   :  { %s467_s15 = smov [#allocation2]   ;;  %s468_s16 = smov [#allocation6]  }
   0x4   :  { %18 = dma.hbm_to_smem %s16_s11, 16, %s467_s15, [#allocation5]  }
   0x5   :  { %s26_s17 = sshll.u32 %s468_s16, 4  ;;  %s27_s17 = int_to_ptr.vmem [resolvable:$true] %s26_s17 }
   0x6   :  { %29 = dma.hbm_to_vmem [thread:$0]  %s25_s14, 256, %s27_s17, [#allocation3]  }
   0x7   :  { %461 = dma.done.wait [#allocation5], 16  }
   0x8   :  { %462 = vsyncadd [#allocation5], 4294967280 }
   0x9   :  { %463 = dma.done.wait [#allocation3], 256  }
   0xa   :  { %464 = vsyncadd [#allocation3], 4294967040 }
   0xb   :  { %38 = sfence }
   0xc   :  { %s39_s18 = sld [smem:[#allocation2]]  ;;  %v42_v0 = vld [vmem:[#allocation6] sm:$0xff]  ;;  %v43_v1 = vld [vmem:[#allocation6 + $0x8] sm:$0xff]  ;;  %v469_v29 = vmov 683565275   ;;  %s476_s1 = smov [#allocation7]  }
   0xd   :  { %s383_s19 = sld [smem:[#allocation2 + $0x1]]  ;;  %v470_v31 = vmov 2475754826   ;;  %v471_v33 = vmov 2131351028   ;;  %s370_s20 = sshll.u32 %s476_s1, 4  ;;  %s371_s20 = int_to_ptr.vmem [resolvable:$true] %s370_s20 }
   0xe   :  { %v472_v35 = vmov 2102212464   ;;  %v473_v37 = vmov 920167782   ;;  %v474_v46 = vmov 1326507024  }
   0xf   :  { %s655_s0 = sld [smem:[#allocation2 + $0x2]]  ;;  %s372_s23 = sshll.u32 %s679_s2, 4  ;;  %s373_s23 = int_to_ptr.hbm [resolvable:$true] %s372_s23 }
  0x12   :  { %v44_v2 = vstv %s39_s18 }
  0x13   :  { %v45_v3 = vmul.f32 %v44_v2, %v42_v0  ;;  %v46_v4 = vmul.f32 %v44_v2, %v43_v1  ;;  %v47_v5 = vstv %s383_s19 }
  0x15   :  { %v498_v6 = vadd.f32 %v47_v5, %v45_v3  ;;  %v500_v7 = vadd.f32 %v47_v5, %v46_v4 }
  0x17   :  { %v50_v8 = vand.u32 2147483647, %v498_v6  ;;  %v53_v9 = vand.u32 2139095040, %v498_v6  ;;  %v205_v10 = vand.u32 2147483647, %v500_v7  ;;  %v208_v11 = vand.u32 2139095040, %v500_v7 }
  0x19   :  { %v54_v12 = vshrl.u32 %v53_v9, 23  ;;  %v57_v13 = vand.u32 8388607, %v50_v8  ;;  %v209_v14 = vshrl.u32 %v208_v11, 23  ;;  %v212_v18 = vand.u32 8388607, %v205_v10 }
  0x1b   :  { %v385_v15 = vadd.s32 4294967169, %v54_v12  ;;  %v58_v16 = vor.u32 8388608, %v57_v13  ;;  %v388_v17 = vadd.s32 4294967169, %v209_v14  ;;  %v213_v23 = vor.u32 8388608, %v212_v18 }
  0x1d   :  { %v60_v19 = vadd.s32 1, %v385_v15  ;;  %v215_v20 = vadd.s32 1, %v388_v17  ;;  %v510_v22 = vshll.u32 %v58_v16, 8  ;;  %v520_v40 = vshll.u32 %v213_v23, 8 }
  0x1f   :  { %vm61_vm0 = vcmp.gt.s32.totalorder %v60_v19, 0  ;;  %vm216_vm1 = vcmp.gt.s32.totalorder %v215_v20, 0  ;;  %v99_v39 = vand.u32 65535, %v510_v22  ;;  %v100_v44 = vshrl.u32 %v510_v22, 16 }
  0x20   :  { %v62_v21 = vsel %vm61_vm0, %v60_v19, 0  ;;  %v217_v25 = vsel %vm216_vm1, %v215_v20, 0 }
  0x21   :  { %v64_v24 = vand.u32 31, %v62_v21  ;;  %v512_v26 = vshrl.u32 %v62_v21, 5  ;;  %v514_v27 = vand.u32 31, %v217_v25  ;;  %v538_v57 = vshrl.u32 %v217_v25, 5 }
  0x23   :  { %v65_v28 = vsub.s32 32, %v64_v24  ;;  %v67_v30 = vshll.u32 %v469_v29, %v64_v24  ;;  %v70_v32 = vshll.u32 %v470_v31, %v64_v24  ;;  %v73_v34 = vshll.u32 %v471_v33, %v64_v24 }
  0x24   :  { %v76_v36 = vshll.u32 %v472_v35, %v64_v24  ;;  %v79_v38 = vshll.u32 %v473_v37, %v64_v24  ;;  %vm82_vm2 = vcmp.lt.s32.totalorder %v512_v26, 1  ;;  %vm85_vm3 = vcmp.lt.s32.totalorder %v512_v26, 4 }
  0x25   :  { %v68_v41 = vshrl.u32 %v470_v31, %v65_v28  ;;  %v71_v42 = vshrl.u32 %v471_v33, %v65_v28  ;;  %v74_v43 = vshrl.u32 %v472_v35, %v65_v28  ;;  %v77_v45 = vshrl.u32 %v473_v37, %v65_v28 }
  0x26   :  { %v80_v47 = vshrl.u32 %v474_v46, %v65_v28  ;;  %v529_v51 = vsub.s32 32, %v514_v27  ;;  %v66_v52 = vshrl.u32 %v469_v29, %v65_v28  ;;  %vm84_vm4 = vcmp.lt.s32.totalorder %v512_v26, 3 }
  0x27   :  { %v69_v48 = vor.u32 %v68_v41, %v67_v30  ;;  %v72_v49 = vor.u32 %v71_v42, %v70_v32  ;;  %v75_v50 = vor.u32 %v74_v43, %v73_v34  ;;  %v78_v53 = vor.u32 %v77_v45, %v76_v36 }
  0x28   :  { %v81_v54 = vor.u32 %v80_v47, %v79_v38  ;;  %vm83_vm5 = vcmp.lt.s32.totalorder %v512_v26, 2  ;;  %v222_v60 = vshll.u32 %v469_v29, %v514_v27  ;;  %v225_v61 = vshll.u32 %v470_v31, %v514_v27 }
  0x29   :  { %v90_v55 = vsel %vm82_vm2, %v69_v48, %v72_v49  ;;  %v94_v56 = vsel %vm82_vm2, %v72_v49, %v75_v50  ;;  %v91_v58 = vsel %vm85_vm3, %v78_v53, 920167782  ;;  %v87_v62 = vsel %vm85_vm3, %v75_v50, 2102212464 }
  0x2a   :  { %v95_v59 = vsel %vm85_vm3, %v81_v54, 1326507024  ;;  %v92_v63 = vsel %vm84_vm4, %v75_v50, %v91_v58  ;;  %v223_v1 = vshrl.u32 %v470_v31, %v529_v51  ;;  %v86_v2 = vsel %vm82_vm2, %v66_v52, %v69_v48 }
  0x2b   :  { %v96_v0 = vsel %vm84_vm4, %v78_v53, %v95_v59  ;;  %v93_v3 = vsel %vm83_vm5, %v90_v55, %v92_v63  ;;  %v226_v5 = vshrl.u32 %v471_v33, %v529_v51  ;;  %v88_v14 = vsel %vm84_vm4, %v72_v49, %v87_v62 }
  0x2c   :  { %v97_v4 = vsel %vm83_vm5, %v94_v56, %v96_v0  ;;  %v123_v12 = vand.u32 65535, %v93_v3  ;;  %v124_v13 = vshrl.u32 %v93_v3, 16  ;;  %v563_v15 = vor.u32 %v223_v1, %v222_v60 }
  0x2d   :  { %v101_v9 = vand.u32 65535, %v97_v4  ;;  %v102_v11 = vshrl.u32 %v97_v4, 16  ;;  %v565_v16 = vor.u32 %v226_v5, %v225_v61  ;;  %v228_v17 = vshll.u32 %v471_v33, %v514_v27 }
  0x2e   :  { %v229_v21 = vshrl.u32 %v472_v35, %v529_v51  ;;  %v125_v24 = vmul.u32 %v123_v12, %v99_v39  ;;  %v126_v25 = vmul.u32 %v124_v13, %v99_v39  ;;  %v127_v28 = vmul.u32 %v123_v12, %v100_v44 }
  0x2f   :  { %v103_v18 = vmul.u32 %v101_v9, %v99_v39  ;;  %v104_v19 = vmul.u32 %v102_v11, %v99_v39  ;;  %v105_v20 = vmul.u32 %v101_v9, %v100_v44  ;;  %v106_v23 = vmul.u32 %v102_v11, %v100_v44 }
  0x30   :  { %v128_v34 = vmul.u32 %v124_v13, %v100_v44  ;;  %v129_v38 = vshll.u32 %v126_v25, 16  ;;  %v130_v41 = vshrl.u32 %v126_v25, 16  ;;  %v131_v42 = vshll.u32 %v127_v28, 16 }
  0x31   :  { %v107_v30 = vshll.u32 %v104_v19, 16  ;;  %v108_v31 = vshrl.u32 %v104_v19, 16  ;;  %v109_v32 = vshll.u32 %v105_v20, 16  ;;  %v110_v36 = vshrl.u32 %v105_v20, 16 }
  0x32   :  { %v132_v43 = vshrl.u32 %v127_v28, 16  ;;  %v231_v45 = vshll.u32 %v472_v35, %v514_v27  ;;  %v475_v47 = vmov 0   ;;  %vm133_vm7 = vc.u32 %v125_v24, %v129_v38 }
  0x33   :  { %vm111_vm6 = vc.u32 %v103_v18, %v107_v30  ;;  %v113_v33 = vadd.s32 %v107_v30, %v103_v18  ;;  %v135_v39 = vadd.s32 %v129_v38, %v125_v24  ;;  %v232_v49 = vshrl.u32 %v473_v37, %v529_v51 }
  0x34   :  { %v112_v48 = vsel %vm111_vm6, 1, %v475_v47  ;;  %v134_v44 = vsel %vm133_vm7, 1, %v475_v47  ;;  %v234_v52 = vshll.u32 %v473_v37, %v514_v27  ;;  %v230_v35 = vor.u32 %v229_v21, %v228_v17 }
  0x35   :  { %v114_v50 = vadd.s32 %v112_v48, %v106_v23  ;;  %vm115_vm8 = vc.u32 %v113_v33, %v109_v32  ;;  %v136_v54 = vadd.s32 %v134_v44, %v128_v34  ;;  %vm137_vm9 = vc.u32 %v135_v39, %v131_v42 }
  0x36   :  { %v116_v53 = vsel %vm115_vm8, 1, %v475_v47  ;;  %v138_v56 = vsel %vm137_vm9, 1, %v475_v47  ;;  %v233_v58 = vor.u32 %v232_v49, %v231_v45  ;;  %v235_v59 = vshrl.u32 %v474_v46, %v529_v51 }
  0x37   :  { %v118_v55 = vadd.s32 %v116_v53, %v114_v50  ;;  %v582_v60 = vadd.s32 %v135_v39, %v131_v42  ;;  %v140_v61 = vadd.s32 %v138_v56, %v136_v54  ;;  %vm237_vm10 = vcmp.lt.s32.totalorder %v538_v57, 1 }
  0x38   :  { %vm239_vm11 = vcmp.lt.s32.totalorder %v538_v57, 3  ;;  %v236_v37 = vor.u32 %v235_v59, %v234_v52  ;;  %vm238_vm12 = vcmp.lt.s32.totalorder %v538_v57, 2  ;;  %vm240_vm13 = vcmp.lt.s32.totalorder %v538_v57, 4 }
  0x39   :  { %v119_v27 = vadd.s32 %v118_v55, %v108_v31  ;;  %v89_v62 = vsel %vm83_vm5, %v86_v2, %v88_v14  ;;  %v141_v63 = vadd.s32 %v140_v61, %v130_v41  ;;  %v245_v46 = vsel %vm237_vm10, %v563_v15, %v565_v16 }
  0x3a   :  { %v246_v0 = vsel %vm240_vm13, %v233_v58, 920167782  ;;  %v249_v4 = vsel %vm237_vm10, %v565_v16, %v230_v35  ;;  %v254_v26 = vand.u32 65535, %v520_v40  ;;  %v250_v9 = vsel %vm240_vm13, %v236_v37, 1326507024 }
  0x3b   :  { %v596_v1 = vadd.s32 %v119_v27, %v110_v36  ;;  %v247_v3 = vsel %vm239_vm11, %v230_v35, %v246_v0  ;;  %v142_v2 = vadd.s32 %v141_v63, %v132_v43  ;;  %v255_v11 = vshrl.u32 %v520_v40, 16 }
  0x3c   :  { %v248_v5 = vsel %vm238_vm12, %v245_v46, %v247_v3  ;;  %v143_v12 = vmul.u32 %v510_v22, %v89_v62  ;;  %v251_v13 = vsel %vm239_vm11, %v233_v58, %v250_v9  ;;  %v221_v24 = vshrl.u32 %v469_v29, %v529_v51 }
  0x3d   :  { %vm145_vm14 = vc.u32 %v596_v1, %v582_v60  ;;  %v278_v14 = vand.u32 65535, %v248_v5  ;;  %v146_v17 = vadd.s32 1, %v142_v2  ;;  %v252_v18 = vsel %vm238_vm12, %v249_v4, %v251_v13 }
  0x3e   :  { %v279_v19 = vshrl.u32 %v248_v5, 16  ;;  %v256_v20 = vand.u32 65535, %v252_v18  ;;  %v257_v21 = vshrl.u32 %v252_v18, 16  ;;  %v242_v41 = vsel %vm240_vm13, %v230_v35, 2102212464 }
  0x3f   :  { %v147_v23 = vsel %vm145_vm14, %v146_v17, %v142_v2  ;;  %v282_v22 = vmul.u32 %v278_v14, %v255_v11  ;;  %v280_v32 = vmul.u32 %v278_v14, %v254_v26  ;;  %v241_v43 = vsel %vm237_vm10, %v221_v24, %v563_v15 }
  0x40   :  { %v281_v25 = vmul.u32 %v279_v19, %v254_v26  ;;  %v148_v28 = vadd.s32 %v147_v23, %v143_v12  ;;  %v258_v30 = vmul.u32 %v256_v20, %v254_v26  ;;  %v259_v31 = vmul.u32 %v257_v21, %v254_v26 }
  0x41   :  { %v260_v34 = vmul.u32 %v256_v20, %v255_v11  ;;  %v261_v42 = vmul.u32 %v257_v21, %v255_v11  ;;  %v283_v29 = vmul.u32 %v279_v19, %v255_v11  ;;  %v286_v51 = vshll.u32 %v282_v22, 16 }
  0x42   :  { %v284_v36 = vshll.u32 %v281_v25, 16  ;;  %v149_v38 = vadd.s32 536870912, %v148_v28  ;;  %v262_v33 = vshll.u32 %v259_v31, 16  ;;  %v243_v49 = vsel %vm239_vm11, %v565_v16, %v242_v41 }
  0x43   :  { %v264_v45 = vshll.u32 %v260_v34, 16  ;;  %v263_v15 = vshrl.u32 %v259_v31, 16  ;;  %v285_v55 = vshrl.u32 %v281_v25, 16  ;;  %v265_v59 = vshrl.u32 %v260_v34, 16 }
  0x44   :  { %v623_v48 = vshrl.u32 %v149_v38, 30  ;;  %vm266_vm15 = vc.u32 %v258_v30, %v262_v33  ;;  %v268_v39 = vadd.s32 %v262_v33, %v258_v30  ;;  %vm288_vm0 = vc.u32 %v280_v32, %v284_v36 }
  0x45   :  { %v267_v50 = vsel %vm266_vm15, 1, %v475_v47  ;;  %v289_v44 = vsel %vm288_vm0, 1, %v475_v47  ;;  %v290_v52 = vadd.s32 %v284_v36, %v280_v32  ;;  %v287_v27 = vshrl.u32 %v282_v22, 16 }
  0x46   :  { %v151_v53 = vshll.u32 %v623_v48, 30  ;;  %v269_v54 = vadd.s32 %v267_v50, %v261_v42  ;;  %vm270_vm1 = vc.u32 %v268_v39, %v264_v45  ;;  %v291_v56 = vadd.s32 %v289_v44, %v283_v29 }
  0x47   :  { %v271_v35 = vsel %vm270_vm1, 1, %v475_v47  ;;  %vm292_vm2 = vc.u32 %v290_v52, %v286_v51  ;;  %v294_v46 = vadd.s32 %v290_v52, %v286_v51  ;;  %v244_v0 = vsel %vm238_vm12, %v241_v43, %v243_v49 }
  0x48   :  { %v152_v58 = vsub.s32 %v148_v28, %v151_v53  ;;  %v273_v61 = vadd.s32 %v271_v35, %v269_v54  ;;  %v293_v16 = vsel %vm292_vm2, 1, %v475_v47  ;;  %v298_v9 = vmul.u32 %v520_v40, %v244_v0 }
  0x49   :  { %v295_v37 = vadd.s32 %v293_v16, %v291_v56  ;;  %v144_v47 = vadd.s32 %v582_v60, %v596_v1  ;;  %v174_v34 = vsub.s32 4, %v623_v48  ;;  %vm52_vm7 = vcmp.lt.s32.totalorder %v498_v6, 0 }
  0x4a   :  { %vm153_vm3 = vcmp.lt.s32.totalorder %v152_v58, 0  ;;  %v154_v62 = vsub.s32 0, %v152_v58  ;;  %v274_v63 = vadd.s32 %v273_v61, %v263_v15  ;;  %vm645_vm8 = vcmp.le.f32.partialorder %v50_v8, 0.7853982 }
  0x4b   :  { %v296_v3 = vadd.s32 %v295_v37, %v285_v55  ;;  %v175_v43 = vsel %vm52_vm7, %v174_v34, %v623_v48  ;;  %vm207_vm11 = vcmp.lt.s32.totalorder %v500_v7, 0  ;;  %vm661_vm13 = vcmp.le.f32.partialorder %v205_v10, 0.7853982 }
  0x4c   :  { %v155_v4 = vsel %vm153_vm3, %v154_v62, %v152_v58  ;;  %v275_v26 = vadd.s32 %v274_v63, %v265_v59  ;;  %v177_v49 = vsel %vm645_vm8, 0, %v175_v43  ;;  %vm193_vm15 = vweird.f32 %v498_v6 }
  0x4d   :  { %v156_v2 = vclz %v155_v4  ;;  %v297_v5 = vadd.s32 %v296_v3, %v287_v27  ;;  %v194_v55 = vadd.s32 3, %v177_v49  ;;  %vm348_vm3 = vweird.f32 %v500_v7 }
  0x4e   :  { %vm300_vm4 = vc.u32 %v275_v26, %v294_v46  ;;  %v299_v39 = vadd.s32 %v294_v46, %v275_v26 }
  0x4f   :  { %v386_v11 = vadd.s32 4294967294, %v156_v2  ;;  %v301_v12 = vadd.s32 1, %v297_v5  ;;  %v195_v62 = vand.u32 3, %v194_v55 }
  0x51   :  { %vm387_vm5 = vcmp.lt.s32.totalorder %v386_v11, 0  ;;  %v302_v13 = vsel %vm300_vm4, %v301_v12, %v297_v5  ;;  %vm200_vm10 = vcmp.eq.s32.totalorder %v195_v62, 2  ;;  %vm197_vm12 = vcmp.eq.s32.totalorder %v195_v62, 0 }
  0x52   :  { %v159_v14 = vsel %vm387_vm5, 0, %v386_v11  ;;  %v303_v17 = vadd.s32 %v302_v13, %v298_v9  ;;  %vm196_vm14 = vcmp.lt.s32.totalorder %v195_v62, 2 }
  0x53   :  { %v160_v18 = vsub.s32 32, %v159_v14  ;;  %v161_v57 = vshll.u32 %v152_v58, %v159_v14  ;;  %v164_v19 = vsub.s32 4294967266, %v159_v14 }
  0x54   :  { %v304_v20 = vadd.s32 536870912, %v303_v17 }
  0x55   :  { %v162_v21 = vshrl.u32 %v144_v47, %v160_v18  ;;  %v165_v23 = vadd.s32 127, %v164_v19 }
  0x56   :  { %v638_v24 = vshrl.u32 %v304_v20, 30 }
  0x57   :  { %v163_v25 = vor.u32 %v162_v21, %v161_v57  ;;  %v166_v40 = vshll.u32 %v165_v23, 23  ;;  %v360_v21 = vstv %s655_s0 }
  0x58   :  { %v306_v22 = vshll.u32 %v638_v24, 30  ;;  %v329_v12 = vsub.s32 4, %v638_v24 }
  0x59   :  { %v167_v28 = vor.u32 4788187, %v166_v40  ;;  %v170_v30 = vcvt.s32.f32 %v163_v25 }
  0x5a   :  { %v307_v31 = vsub.s32 %v303_v17, %v306_v22  ;;  %v330_v19 = vsel %vm207_vm11, %v329_v12, %v638_v24 }
  0x5b   :  { %v168_v60 = vand.u32 2147483647, %v167_v28  ;;  %v332_v40 = vsel %vm661_vm13, 0, %v330_v19 }
  0x5c   :  { %vm308_vm6 = vcmp.lt.s32.totalorder %v307_v31, 0  ;;  %v309_v1 = vsub.s32 0, %v307_v31 }
  0x5d   :  { %v171_v32 = vmul.f32 %v170_v30, %v168_v60  ;;  %v349_v60 = vadd.s32 3, %v332_v40 }
  0x5e   :  { %v310_v36 = vsel %vm308_vm6, %v309_v1, %v307_v31 }
  0x5f   :  { %v172_v41 = vxor.u32 2147483648, %v171_v32  ;;  %v311_v42 = vclz %v310_v36  ;;  %v350_v36 = vand.u32 3, %v349_v60 }
  0x61   :  { %v173_v33 = vsel %vm52_vm7, %v172_v41, %v171_v32  ;;  %v389_v45 = vadd.s32 4294967294, %v311_v42  ;;  %vm355_vm0 = vcmp.eq.s32.totalorder %v350_v36, 2  ;;  %vm352_vm1 = vcmp.eq.s32.totalorder %v350_v36, 0 }
  0x62   :  { %v176_v29 = vsel %vm645_vm8, %v498_v6, %v173_v33  ;;  %vm351_vm2 = vcmp.lt.s32.totalorder %v350_v36, 2 }
  0x63   :  { %v178_v51 = vmul.f32 %v176_v29, %v176_v29  ;;  %vm390_vm9 = vcmp.lt.s32.totalorder %v389_v45, 0 }
  0x64   :  { %v314_v8 = vsel %vm390_vm9, 0, %v389_v45 }
  0x65   :  { %v179_v50 = vmul.f32 -0.001358992, %v178_v51  ;;  %v186_v44 = vmul.f32 -0.00019511016, %v178_v51  ;;  %v315_v52 = vsub.s32 32, %v314_v8  ;;  %v316_v53 = vshll.u32 %v307_v31, %v314_v8 }
  0x66   :  { %v319_v15 = vsub.s32 4294967266, %v314_v8 }
  0x67   :  { %v180_v54 = vadd.f32 0.041655596, %v179_v50  ;;  %v187_v35 = vadd.f32 0.008332121, %v186_v44  ;;  %v317_v48 = vshrl.u32 %v299_v39, %v315_v52 }
  0x68   :  { %v320_v56 = vadd.s32 127, %v319_v15 }
  0x69   :  { %v181_v58 = vmul.f32 %v180_v54, %v178_v51  ;;  %v188_v59 = vmul.f32 %v187_v35, %v178_v51  ;;  %v318_v61 = vor.u32 %v317_v48, %v316_v53 }
  0x6a   :  { %v321_v16 = vshll.u32 %v320_v56, 23 }
  0x6b   :  { %v182_v27 = vadd.f32 -0.4999988, %v181_v58  ;;  %v189_v37 = vadd.f32 -0.16666654, %v188_v59  ;;  %v325_v46 = vcvt.s32.f32 %v318_v61 }
  0x6c   :  { %v322_v63 = vor.u32 4788187, %v321_v16 }
  0x6d   :  { %v183_v0 = vmul.f32 %v182_v27, %v178_v51  ;;  %v190_v3 = vmul.f32 %v189_v37, %v178_v51 }
  0x6e   :  { %v323_v4 = vand.u32 2147483647, %v322_v63 }
  0x6f   :  { %v184_v26 = vadd.f32 1.0, %v183_v0  ;;  %v191_v2 = vadd.f32 1.0, %v190_v3 }
  0x70   :  { %v326_v5 = vmul.f32 %v325_v46, %v323_v4 }
  0x71   :  { %v192_v9 = vmul.f32 %v191_v2, %v176_v29  ;;  %v201_v11 = vxor.u32 2147483648, %v184_v26 }
  0x72   :  { %v327_v13 = vxor.u32 2147483648, %v326_v5 }
  0x73   :  { %v198_v14 = vxor.u32 2147483648, %v192_v9  ;;  %v202_v17 = vsel %vm200_vm10, %v201_v11, %v192_v9 }
  0x74   :  { %v328_v18 = vsel %vm207_vm11, %v327_v13, %v326_v5 }
  0x75   :  { %v199_v57 = vsel %vm197_vm12, %v184_v26, %v198_v14  ;;  %v331_v20 = vsel %vm661_vm13, %v500_v7, %v328_v18 }
  0x76   :  { %v203_v23 = vsel %vm196_vm14, %v199_v57, %v202_v17  ;;  %v333_v10 = vmul.f32 %v331_v20, %v331_v20 }
  0x77   :  { %v204_v25 = vsel %vm193_vm15, nan, %v203_v23 }
  0x78   :  { %v334_v22 = vmul.f32 -0.001358992, %v333_v10  ;;  %v341_v28 = vmul.f32 -0.00019511016, %v333_v10  ;;  %v361_v30 = vmul.f32 %v360_v21, %v204_v25 }
  0x7a   :  { %v335_v31 = vadd.f32 0.041655596, %v334_v22  ;;  %v342_v6 = vadd.f32 0.008332121, %v341_v28  ;;  %363 = vst [vmem:[#allocation7] sm:$0xff] %v361_v30 }
  0x7c   :  { %v336_v1 = vmul.f32 %v335_v31, %v333_v10  ;;  %v343_v24 = vmul.f32 %v342_v6, %v333_v10 }
  0x7e   :  { %v337_v32 = vadd.f32 -0.4999988, %v336_v1  ;;  %v344_v34 = vadd.f32 -0.16666654, %v343_v24 }
  0x80   :  { %v338_v38 = vmul.f32 %v337_v32, %v333_v10  ;;  %v345_v41 = vmul.f32 %v344_v34, %v333_v10 }
  0x82   :  { %v339_v42 = vadd.f32 1.0, %v338_v38  ;;  %v346_v33 = vadd.f32 1.0, %v345_v41 }
  0x84   :  { %v347_v43 = vmul.f32 %v346_v33, %v331_v20  ;;  %v356_v45 = vxor.u32 2147483648, %v339_v42 }
  0x86   :  { %v353_v29 = vxor.u32 2147483648, %v347_v43  ;;  %v357_v51 = vsel %vm355_vm0, %v356_v45, %v347_v43 }
  0x88   :  { %v354_v39 = vsel %vm352_vm1, %v339_v42, %v353_v29 }
  0x89   :  { %v358_v49 = vsel %vm351_vm2, %v354_v39, %v357_v51 }
  0x8a   :  { %v359_v8 = vsel %vm348_vm3, nan, %v358_v49 }
  0x8b   :  { %v362_v50 = vmul.f32 %v360_v21, %v359_v8 }
  0x8d   :  { %364 = vst [vmem:[#allocation7 + $0x8] sm:$0xff] %v362_v50 }
  0x8e   :  { %375 = dma.vmem_to_hbm [thread:$0]  %s371_s20, 256, %s373_s23, [#allocation4]  }
  0x8f   :  { %465 = dma.done.wait [#allocation4], 256  }
  0x90   :  { %466 = vsyncadd [#allocation4], 4294967040 }
  0x91   :  { %380 = vsyncpa [#allocation3], 1 }
  0x92   :  { %381 = vsyncpa [#allocation4], 1 }
  0x93   :  { %382 = vsyncpa [#allocation5], 1 }

</bundles_post_ra>
